<compile_context>
chip_gen: v6e
topology: v6e:2x2x1
jax: 0.10.0
libtpu: 0.0.40
codegen_flags: <defaults>
</compile_context>

<pallas_src>
import math
from functools import partial

import jax
import jax.numpy as jnp
from jax.experimental import pallas as pl
from jax.experimental.pallas import tpu as pltpu


def _round_up(x, m):
    return (x + m - 1) // m * m


def _pick_tile(n, cands):
    for c in cands:
        if n % c == 0:
            return c
    return n


def _pick_m_tile(m, cap=1024):
    if m <= cap:
        return m
    best = 8
    for d in range(8, cap + 1, 8):
        if m % d == 0:
            best = d
    return best


def _pick_bblk(B, Sp, n_other_parallel):
    """Batch block: big enough for a well-fed MXU M-tile, but keep >=2 parallel grid blocks
    overall when possible (v7x has 2 TensorCores)."""
    bblk = 1
    for cand in (16, 8, 4, 2, 1):
        if B % cand == 0 and cand * Sp <= 1024:
            bblk = cand
            break
    while bblk > 1 and (B // bblk) * n_other_parallel < 2:
        bblk //= 2
        while bblk > 1 and B % bblk:
            bblk //= 2
    return max(bblk, 1)


# ---------------------------------------------------------------------------
# Kernel 1 (fused): fc1 matmul K-reduction; epilogue = bias + GELU + depthwise
#   5x5 conv + BN(affine) + Hardswish on token rows + CLS bypass, all written as
#   one bf16 (bblk*Sp, tn) sequence block that fc2 consumes directly.
# ---------------------------------------------------------------------------
def _fc1_dwconv_kernel(x_ref, w_ref, b_ref, dww_ref, scale_ref, bias_ref,
                       o_ref, acc_ref, xpad_ref,
                       *, bblk, Sp, H, W, ksize, off):
    # ---- K-reduction: one big MXU dot per grid step (bf16 x bf16 -> f32 acc) ----
    @pl.when(pl.program_id(2) == 0)
    def _init():
        acc_ref[...] = jnp.zeros_like(acc_ref)

    acc_ref[...] += jnp.dot(x_ref[...], w_ref[...],
                            preferred_element_type=jnp.float32)

    # ---- epilogue on the last K step ----
    @pl.when(pl.program_id(2) == pl.num_programs(2) - 1)
    def _epilogue():
        pad = (ksize - 1) // 2
        HW = H * W
        tn = acc_ref.shape[-1]

        h = acc_ref[...] + b_ref[...]                     # (bblk*Sp, tn) f32 bias add
        # exact (erf) GELU, matching torch.nn.GELU(approximate='none')
        h = 0.5 * h * (1.0 + jax.lax.erf(h * 0.7071067811865476))

        taps = dww_ref[...]                               # (ksize*ksize, tn) f32
        scale = scale_ref[...]                            # (1, tn)
        bias = bias_ref[...]                              # (1, tn)

        # per-dj column-validity masks: source column j + dj - pad must be in [0, W)
        jj = jax.lax.broadcasted_iota(jnp.int32, (HW, 1), 0) % W
        col_masks = [((jj >= pad - dj) & (jj < W + pad - dj)).astype(jnp.float32)
                     for dj in range(ksize)]

        # flat zero-padded token buffer: rows [off, off+HW) hold tokens, rest is halo
        xpad_ref[...] = jnp.zeros_like(xpad_ref)

        zero_tail = None
        if Sp > 1 + HW:
            zero_tail = jnp.zeros((Sp - 1 - HW, tn), o_ref.dtype)

        for b in range(bblk):                             # small static unroll
            base = b * Sp
            # one bulk, sublane-aligned store of this sequence's tokens into the scratch
            xpad_ref[pl.ds(off, HW), :] = h[base + 1: base + 1 + HW, :]

            acc = jnp.zeros((HW, tn), jnp.float32)
            for dj in range(ksize):
                part = jnp.zeros((HW, tn), jnp.float32)
                for di in range(ksize):
                    start = off + (di - pad) * W + (dj - pad)
                    part = part + (xpad_ref[pl.ds(start, HW), :]
                                   * taps[di * ksize + dj: di * ksize + dj + 1, :])
                acc = acc + part * col_masks[dj]

            y = acc * scale + bias                        # eval-mode BatchNorm2d (folded affine)
            y = y * jnp.clip(y + 3.0, 0.0, 6.0) * (1.0 / 6.0)   # Hardswish

            # fused [CLS bypass | conv tokens | zero pad rows] sequence block (bf16)
            o_ref[pl.ds(base, 1), :] = h[base:base + 1, :].astype(o_ref.dtype)
            o_ref[pl.ds(base + 1, HW), :] = y.astype(o_ref.dtype)
            if zero_tail is not None:
                o_ref[pl.ds(base + 1 + HW, Sp - 1 - HW), :] = zero_tail


def fc1_dwconv_bn_hswish(x_flat, w1, b1, dw_taps, bn_scale, bn_bias, *,
                         B, Sp, H, W, ksize=5):
    M, Kp = x_flat.shape
    _, Cp = w1.shape
    assert M == B * Sp and Sp % 8 == 0 and Kp % 128 == 0 and Cp % 128 == 0

    tk = Kp if Kp <= 1024 else _pick_tile(Kp, (1024, 512, 256, 128))
    tn = Cp if Cp <= 512 else _pick_tile(Cp, (512, 256, 128))
    bblk = _pick_bblk(B, Sp, Cp // tn)

    pad = (ksize - 1) // 2
    off = _round_up(pad * (W + 1), 8)                     # aligned token-block offset
    rows = _round_up(off + H * W + pad * (W + 1), 8)      # flat padded buffer rows

    grid = (B // bblk, Cp // tn, Kp // tk)

    flops = 2 * M * Kp * Cp + 2 * B * H * W * Cp * ksize * ksize
    bytes_accessed = int(M * Kp * 2 * (Cp // tn)          # x re-read per channel tile
                         + Kp * Cp * 2 * (B // bblk)      # w re-read per batch tile
                         + M * Cp * 2)                    # bf16 fused sequence output
    est_vmem = (2 * bblk * Sp * tk * 2 + 2 * tk * tn * 2 + 2 * bblk * Sp * tn * 2
                + 3 * bblk * Sp * tn * 4 + rows * tn * 4 + (ksize * ksize + 3) * tn * 4)
    vmem_limit = int(min(48 * 2 ** 20, max(32 * 2 ** 20, 2 * est_vmem)))

    kernel = partial(_fc1_dwconv_kernel, bblk=bblk, Sp=Sp, H=H, W=W,
                     ksize=ksize, off=off)

    return pl.pallas_call(
        kernel,
        out_shape=jax.ShapeDtypeStruct((M, Cp), jnp.bfloat16),
        grid_spec=pltpu.PrefetchScalarGridSpec(
            num_scalar_prefetch=0,
            grid=grid,
            in_specs=[
                pl.BlockSpec((bblk * Sp, tk), lambda bi, j, k: (bi, k)),
                pl.BlockSpec((tk, tn), lambda bi, j, k: (k, j)),
                pl.BlockSpec((1, tn), lambda bi, j, k: (0, j)),
                pl.BlockSpec((ksize * ksize, tn), lambda bi, j, k: (0, j)),
                pl.BlockSpec((1, tn), lambda bi, j, k: (0, j)),
                pl.BlockSpec((1, tn), lambda bi, j, k: (0, j)),
            ],
            out_specs=pl.BlockSpec((bblk * Sp, tn), lambda bi, j, k: (bi, j)),
            scratch_shapes=[
                pltpu.VMEM((bblk * Sp, tn), jnp.float32),   # f32 matmul accumulator
                pltpu.VMEM((rows, tn), jnp.float32),        # zero-padded flat token image
            ],
        ),
        compiler_params=pltpu.CompilerParams(
            dimension_semantics=("parallel", "parallel", "arbitrary"),
            vmem_limit_bytes=vmem_limit,
        ),
        cost_estimate=pl.CostEstimate(
            flops=int(flops), transcendentals=int(M * Cp),
            bytes_accessed=bytes_accessed),
    )(x_flat, w1, b1, dw_taps, bn_scale, bn_bias)


# ---------------------------------------------------------------------------
# Kernel 2: plain flattened-M tiled matmul + bias (fc2)
# ---------------------------------------------------------------------------
def _linear_kernel(x_ref, w_ref, b_ref, o_ref, acc_ref):
    @pl.when(pl.program_id(2) == 0)
    def _init():
        acc_ref[...] = jnp.zeros_like(acc_ref)

    acc_ref[...] += jnp.dot(x_ref[...], w_ref[...],
                            preferred_element_type=jnp.float32)

    @pl.when(pl.program_id(2) == pl.num_programs(2) - 1)
    def _epilogue():
        o_ref[...] = (acc_ref[...] + b_ref[...]).astype(o_ref.dtype)


def linear_flat(x, w, b, out_dtype=jnp.float32):
    M, K = x.shape
    _, N = w.shape
    assert M % 8 == 0 and K % 128 == 0 and N % 128 == 0

    tm = _pick_m_tile(M, cap=1024)
    tk = K if K <= 1024 else _pick_tile(K, (1024, 512, 256, 128))
    tn = N if N <= 512 else _pick_tile(N, (512, 256, 128))
    if M // tm == 1 and N // tn == 1 and tm % 16 == 0:
        tm //= 2                                           # keep both v7x cores busy

    grid = (M // tm, N // tn, K // tk)
    est_vmem = (2 * tm * tk * x.dtype.itemsize + 2 * tk * tn * w.dtype.itemsize
                + 2 * tm * tn * jnp.dtype(out_dtype).itemsize + tm * tn * 4 + 4 * tn)
    vmem_limit = int(min(48 * 2 ** 20, max(32 * 2 ** 20, 2 * est_vmem)))

    return pl.pallas_call(
        _linear_kernel,
        out_shape=jax.ShapeDtypeStruct((M, N), out_dtype),
        grid_spec=pltpu.PrefetchScalarGridSpec(
            num_scalar_prefetch=0,
            grid=grid,
            in_specs=[
                pl.BlockSpec((tm, tk), lambda i, j, k: (i, k)),
                pl.BlockSpec((tk, tn), lambda i, j, k: (k, j)),
                pl.BlockSpec((1, tn), lambda i, j, k: (0, j)),
            ],
            out_specs=pl.BlockSpec((tm, tn), lambda i, j, k: (i, j)),
            scratch_shapes=[pltpu.VMEM((tm, tn), jnp.float32)],
        ),
        compiler_params=pltpu.CompilerParams(
            dimension_semantics=("parallel", "parallel", "arbitrary"),
            vmem_limit_bytes=vmem_limit,
        ),
        cost_estimate=pl.CostEstimate(
            flops=int(2 * M * K * N), transcendentals=0,
            bytes_accessed=int(M * K * x.dtype.itemsize * (N // tn)
                               + K * N * w.dtype.itemsize * (M // tm)
                               + M * N * jnp.dtype(out_dtype).itemsize)),
    )(x, w, b)


# ---------------------------------------------------------------------------
# Full DwMlp forward
# ---------------------------------------------------------------------------
def dwmlp_forward(x, params, ksize=5):
    B, S, Cin = x.shape
    N = S - 1
    H = W = int(math.sqrt(N))
    assert H * W == N, "token count must be a perfect square"
    hidden = params["w1"].shape[1]
    out_features = params["w2"].shape[1]

    Sp = _round_up(S, 8)            # pad sequence so flattened M stays sublane-aligned
    Kp = _round_up(Cin, 128)
    Cp = _round_up(hidden, 128)
    Op = _round_up(out_features, 128)

    # fc1 input: bf16 once in the wrapper, flattened to (B*Sp, Kp); padded rows/cols are zero
    xp = jnp.pad(x, ((0, 0), (0, Sp - S), (0, Kp - Cin))).astype(jnp.bfloat16)
    x_flat = xp.reshape(B * Sp, Kp)

    w1 = jnp.pad(params["w1"], ((0, Kp - Cin), (0, Cp - hidden))).astype(jnp.bfloat16)
    b1 = jnp.pad(params["b1"], (0, Cp - hidden)).astype(jnp.float32).reshape(1, Cp)
    dw_taps = jnp.pad(params["dw_w"].reshape(ksize * ksize, hidden),
                      ((0, 0), (0, Cp - hidden))).astype(jnp.float32)
    scale = jnp.pad(params["bn_scale"], (0, Cp - hidden)).astype(jnp.float32).reshape(1, Cp)
    bias = jnp.pad(params["bn_bias"], (0, Cp - hidden)).astype(jnp.float32).reshape(1, Cp)

    # fused fc1 + GELU + depthwise 5x5 + BN + hardswish + CLS concat (bf16 sequence out)
    seq = fc1_dwconv_bn_hswish(x_flat, w1, b1, dw_taps, scale, bias,
                               B=B, Sp=Sp, H=H, W=W, ksize=ksize)

    # fc2 consumes the bf16 sequence directly (zero-padded K rows / N cols contribute nothing)
    w2 = jnp.pad(params["w2"], ((0, Cp - hidden), (0, Op - out_features))).astype(jnp.bfloat16)
    b2 = jnp.pad(params["b2"], (0, Op - out_features)).astype(jnp.float32).reshape(1, Op)
    out_flat = linear_flat(seq, w2, b2, out_dtype=jnp.float32)

    return out_flat.reshape(B, Sp, Op)[:, :S, :out_features]


# ---------------------------------------------------------------------------
# Deterministic parameter init (mirrors the module's tensor shapes)
# ---------------------------------------------------------------------------
def init_params(key, in_features, hidden_features, out_features, ksize=5):
    k1, k2, k3, k4, k5 = jax.random.split(key, 5)
    w1 = jax.random.normal(k1, (in_features, hidden_features), jnp.float32) * 0.05
    b1 = jax.random.normal(k2, (hidden_features,), jnp.float32) * 0.05
    w2 = jax.random.normal(k3, (hidden_features, out_features), jnp.float32) * 0.05
    b2 = jax.random.normal(k4, (out_features,), jnp.float32) * 0.05
    # depthwise weight laid out (kh, kw, C)  ==  torch weight[c, 0, kh, kw]
    dw_w = jax.random.normal(k5, (ksize, ksize, hidden_features), jnp.float32) * 0.05
    # BatchNorm2d folded (eval mode, fresh init): scale = gamma/sqrt(var+eps), bias = beta - mean*scale
    eps = 1e-5
    gamma = jnp.ones((hidden_features,), jnp.float32)
    beta = jnp.zeros((hidden_features,), jnp.float32)
    mean = jnp.zeros((hidden_features,), jnp.float32)
    var = jnp.ones((hidden_features,), jnp.float32)
    scale = gamma / jnp.sqrt(var + eps)
    bias = beta - mean * scale
    return dict(w1=w1, b1=b1, w2=w2, b2=b2, dw_w=dw_w, bn_scale=scale, bn_bias=bias)


# ---------------------------------------------------------------------------
# Pure-JAX reference mirroring the kernel's precision choices (bf16 MXU operands,
# f32 accumulation/GELU/conv, bf16 fused sequence) for correctness checking.
# ---------------------------------------------------------------------------
def dwmlp_reference(x, params, ksize=5):
    B, S, Cin = x.shape
    N = S - 1
    H = W = int(math.sqrt(N))
    pad = (ksize - 1) // 2

    xb = x.astype(jnp.bfloat16)
    w1b = params["w1"].astype(jnp.bfloat16)
    h = jnp.dot(xb, w1b, preferred_element_type=jnp.float32) + params["b1"]
    h = 0.5 * h * (1.0 + jax.lax.erf(h * 0.7071067811865476))   # f32 GELU

    C = h.shape[-1]
    cls = h[:, :1, :]
    tok = h[:, 1:, :].reshape(B, H, W, C)
    xp = jnp.pad(tok, ((0, 0), (pad, pad), (pad, pad), (0, 0)))
    acc = jnp.zeros((B, H, W, C), jnp.float32)
    for di in range(ksize):
        for dj in range(ksize):
            acc = acc + xp[:, di:di + H, dj:dj + W, :] * params["dw_w"][di, dj, :]
    y = acc * params["bn_scale"] + params["bn_bias"]
    y = y * jnp.clip(y + 3.0, 0.0, 6.0) / 6.0
    seq = jnp.concatenate([cls, y.reshape(B, N, C)], axis=1).astype(jnp.bfloat16)

    w2b = params["w2"].astype(jnp.bfloat16)
    out = jnp.dot(seq, w2b, preferred_element_type=jnp.float32) + params["b2"]
    return out


if __name__ == "__main__":
    B = 2
    in_features = 16
    hidden_features = 32
    out_features = 16          # out_features defaults to in_features in the module
    H = W = 4
    S = 1 + H * W              # CLS token + 16 patch tokens

    key = jax.random.PRNGKey(0)
    kx, kp = jax.random.split(key)
    x = jax.random.normal(kx, (B, S, in_features), jnp.float32)
    params = init_params(kp, in_features, hidden_features, out_features, ksize=5)

    out = jax.jit(dwmlp_forward)(x, params)
    out = jax.block_until_ready(out)

    ref = dwmlp_reference(x, params)
    assert out.shape == (B, S, out_features), out.shape
    err = float(jnp.max(jnp.abs(out - ref)))
    assert jnp.allclose(out, ref, rtol=2e-2, atol=5e-3), err

    print("KERNEL_OK")
</pallas_src>

<mosaic_0001>
module attributes {stable_mosaic.version = 11 : i64} {
  func.func @_fc1_dwconv_kernel(%arg0: i32, %arg1: i32, %arg2: i32, %arg3: memref<24x128xbf16, #tpu.memory_space<vmem>>, %arg4: memref<128x128xbf16, #tpu.memory_space<vmem>>, %arg5: memref<1x128xf32, #tpu.memory_space<vmem>>, %arg6: memref<25x128xf32, #tpu.memory_space<vmem>>, %arg7: memref<1x128xf32, #tpu.memory_space<vmem>>, %arg8: memref<1x128xf32, #tpu.memory_space<vmem>>, %arg9: memref<24x128xbf16, #tpu.memory_space<vmem>>, %arg10: memref<24x128xf32, #tpu.memory_space<vmem>>, %arg11: memref<48x128xf32, #tpu.memory_space<vmem>>) attributes {dimension_semantics = [#tpu.dimension_semantics<parallel>, #tpu.dimension_semantics<parallel>, #tpu.dimension_semantics<arbitrary>], iteration_bounds = array<i64: 2, 1, 1>, scalar_prefetch = 0 : i64, scratch_operands = 2 : i64, tpu.core_type = #tpu.core_type<tc>, window_params = [{transform_indices = @transform_0, window_bounds = array<i64: 24, 128>}, {transform_indices = @transform_1, window_bounds = array<i64: 128, 128>}, {transform_indices = @transform_2, window_bounds = array<i64: 1, 128>}, {transform_indices = @transform_3, window_bounds = array<i64: 25, 128>}, {transform_indices = @transform_4, window_bounds = array<i64: 1, 128>}, {transform_indices = @transform_5, window_bounds = array<i64: 1, 128>}, {transform_indices = @transform_6, window_bounds = array<i64: 24, 128>}]} {
    %c0_i32 = arith.constant 0 : i32
    %0 = arith.cmpi eq, %arg2, %c0_i32 : i32
    %1 = arith.extui %0 : i1 to i32
    %c0_i32_0 = arith.constant 0 : i32
    %2 = arith.cmpi ne, %1, %c0_i32_0 : i32
    scf.if %2 {
      %cst_10 = arith.constant 0.000000e+00 : f32
      %12 = vector.broadcast %cst_10 : f32 to vector<24x128xf32>
      %c0_11 = arith.constant 0 : index
      %c0_12 = arith.constant 0 : index
      %13 = vector.load %arg10[%c0_11, %c0_12] : memref<24x128xf32, #tpu.memory_space<vmem>>, vector<24x128xf32>
      tpu.vector_store %arg10[%c0_11, %c0_12], %12 {strides = array<i32>} : memref<24x128xf32, #tpu.memory_space<vmem>>, vector<24x128xf32>,
    } else {
    }
    %c0 = arith.constant 0 : index
    %c0_1 = arith.constant 0 : index
    %3 = vector.load %arg10[%c0, %c0_1] : memref<24x128xf32, #tpu.memory_space<vmem>>, vector<24x128xf32>
    %c0_2 = arith.constant 0 : index
    %c0_3 = arith.constant 0 : index
    %4 = vector.load %arg3[%c0_2, %c0_3] : memref<24x128xbf16, #tpu.memory_space<vmem>>, vector<24x128xbf16>
    %c0_4 = arith.constant 0 : index
    %c0_5 = arith.constant 0 : index
    %5 = vector.load %arg4[%c0_4, %c0_5] : memref<128x128xbf16, #tpu.memory_space<vmem>>, vector<128x128xbf16>
    %cst = arith.constant dense<0.000000e+00> : vector<24x128xf32>
    %6 = tpu.matmul %4, %5, %cst {dimension_numbers = #tpu.dot_dimension_numbers<[1], [0], [0], [1], [0, 0, 1, 1], [], []>} : vector<24x128xbf16>, vector<128x128xbf16>, vector<24x128xf32> -> vector<24x128xf32>
    %7 = arith.addf %3, %6 : vector<24x128xf32>
    %c0_6 = arith.constant 0 : index
    %c0_7 = arith.constant 0 : index
    %8 = vector.load %arg10[%c0_6, %c0_7] : memref<24x128xf32, #tpu.memory_space<vmem>>, vector<24x128xf32>
    tpu.vector_store %arg10[%c0_6, %c0_7], %7 {strides = array<i32>} : memref<24x128xf32, #tpu.memory_space<vmem>>, vector<24x128xf32>,
    %c0_i32_8 = arith.constant 0 : i32
    %9 = arith.cmpi eq, %arg2, %c0_i32_8 : i32
    %10 = arith.extui %9 : i1 to i32
    %c0_i32_9 = arith.constant 0 : i32
    %11 = arith.cmpi ne, %10, %c0_i32_9 : i32
    scf.if %11 {
      %c0_10 = arith.constant 0 : index
      %c0_11 = arith.constant 0 : index
      %12 = vector.load %arg10[%c0_10, %c0_11] : memref<24x128xf32, #tpu.memory_space<vmem>>, vector<24x128xf32>
      %c0_12 = arith.constant 0 : index
      %c0_13 = arith.constant 0 : index
      %13 = vector.load %arg5[%c0_12, %c0_13] : memref<1x128xf32, #tpu.memory_space<vmem>>, vector<1x128xf32>
      %14 = vector.broadcast %13 : vector<1x128xf32> to vector<24x128xf32>
      %15 = arith.addf %12, %14 : vector<24x128xf32>
      %cst_14 = arith.constant 5.000000e-01 : f32
      %16 = vector.broadcast %cst_14 : f32 to vector<24x128xf32>
      %17 = arith.mulf %16, %15 : vector<24x128xf32>
      %cst_15 = arith.constant 0.707106769 : f32
      %18 = vector.broadcast %cst_15 : f32 to vector<24x128xf32>
      %19 = arith.mulf %15, %18 : vector<24x128xf32>
      %20 = math.erf %19 : vector<24x128xf32>
      %cst_16 = arith.constant 1.000000e+00 : f32
      %21 = vector.broadcast %cst_16 : f32 to vector<24x128xf32>
      %22 = arith.addf %21, %20 : vector<24x128xf32>
      %23 = arith.mulf %17, %22 : vector<24x128xf32>
      %c0_17 = arith.constant 0 : index
      %c0_18 = arith.constant 0 : index
      %24 = vector.load %arg6[%c0_17, %c0_18] : memref<25x128xf32, #tpu.memory_space<vmem>>, vector<25x128xf32>
      %c0_19 = arith.constant 0 : index
      %c0_20 = arith.constant 0 : index
      %25 = vector.load %arg7[%c0_19, %c0_20] : memref<1x128xf32, #tpu.memory_space<vmem>>, vector<1x128xf32>
      %c0_21 = arith.constant 0 : index
      %c0_22 = arith.constant 0 : index
      %26 = vector.load %arg8[%c0_21, %c0_22] : memref<1x128xf32, #tpu.memory_space<vmem>>, vector<1x128xf32>
      %27 = tpu.iota {dimensions = array<i32: 0>} : vector<16x1xi32>
      %c4_i32 = arith.constant 4 : i32
      %c0_i32_23 = arith.constant 0 : i32
      %28 = arith.cmpi eq, %c4_i32, %c0_i32_23 : i32
      %c1_i32 = arith.constant 1 : i32
      %29 = arith.select %28, %c1_i32, %c4_i32 : i32
      %30 = vector.broadcast %29 : i32 to vector<16x1xi32>
      %31 = arith.remsi %27, %30 : vector<16x1xi32>
      %c0_i32_24 = arith.constant 0 : i32
      %32 = vector.broadcast %c0_i32_24 : i32 to vector<16x1xi32>
      %33 = arith.cmpi ne, %31, %32 : vector<16x1xi32>
      %c0_i32_25 = arith.constant 0 : i32
      %34 = vector.broadcast %c0_i32_25 : i32 to vector<16x1xi32>
      %35 = arith.cmpi slt, %31, %34 : vector<16x1xi32>
      %c0_i32_26 = arith.constant 0 : i32
      %36 = arith.cmpi slt, %29, %c0_i32_26 : i32
      %37 = vector.broadcast %36 : i1 to vector<16x1xi1>
      %38 = vector.broadcast %37 : vector<16x1xi1> to vector<16x1xi1>
      %39 = arith.xori %35, %38 : vector<16x1xi1>
      %40 = arith.andi %39, %33 : vector<16x1xi1>
      %41 = vector.broadcast %29 : i32 to vector<16x1xi32>
      %42 = arith.addi %31, %41 : vector<16x1xi32>
      %43 = arith.select %40, %42, %31 : vector<16x1xi1>, vector<16x1xi32>
      %c2_i32 = arith.constant 2 : i32
      %44 = vector.broadcast %c2_i32 : i32 to vector<16x1xi32>
      %45 = arith.cmpi sge, %43, %44 : vector<16x1xi32>
      %c6_i32 = arith.constant 6 : i32
      %46 = vector.broadcast %c6_i32 : i32 to vector<16x1xi32>
      %47 = arith.cmpi slt, %43, %46 : vector<16x1xi32>
      %48 = arith.andi %45, %47 : vector<16x1xi1>
      %49 = arith.extui %48 : vector<16x1xi1> to vector<16x1xi32>
      %50 = arith.sitofp %49 : vector<16x1xi32> to vector<16x1xf32>
      %c1_i32_27 = arith.constant 1 : i32
      %51 = vector.broadcast %c1_i32_27 : i32 to vector<16x1xi32>
      %52 = arith.cmpi sge, %43, %51 : vector<16x1xi32>
      %c5_i32 = arith.constant 5 : i32
      %53 = vector.broadcast %c5_i32 : i32 to vector<16x1xi32>
      %54 = arith.cmpi slt, %43, %53 : vector<16x1xi32>
      %55 = arith.andi %52, %54 : vector<16x1xi1>
      %56 = arith.extui %55 : vector<16x1xi1> to vector<16x1xi32>
      %57 = arith.sitofp %56 : vector<16x1xi32> to vector<16x1xf32>
      %c0_i32_28 = arith.constant 0 : i32
      %58 = vector.broadcast %c0_i32_28 : i32 to vector<16x1xi32>
      %59 = arith.cmpi sge, %43, %58 : vector<16x1xi32>
      %c4_i32_29 = arith.constant 4 : i32
      %60 = vector.broadcast %c4_i32_29 : i32 to vector<16x1xi32>
      %61 = arith.cmpi slt, %43, %60 : vector<16x1xi32>
      %62 = arith.andi %59, %61 : vector<16x1xi1>
      %63 = arith.extui %62 : vector<16x1xi1> to vector<16x1xi32>
      %64 = arith.sitofp %63 : vector<16x1xi32> to vector<16x1xf32>
      %c-1_i32 = arith.constant -1 : i32
      %65 = vector.broadcast %c-1_i32 : i32 to vector<16x1xi32>
      %66 = arith.cmpi sge, %43, %65 : vector<16x1xi32>
      %c3_i32 = arith.constant 3 : i32
      %67 = vector.broadcast %c3_i32 : i32 to vector<16x1xi32>
      %68 = arith.cmpi slt, %43, %67 : vector<16x1xi32>
      %69 = arith.andi %66, %68 : vector<16x1xi1>
      %70 = arith.extui %69 : vector<16x1xi1> to vector<16x1xi32>
      %71 = arith.sitofp %70 : vector<16x1xi32> to vector<16x1xf32>
      %c-2_i32 = arith.constant -2 : i32
      %72 = vector.broadcast %c-2_i32 : i32 to vector<16x1xi32>
      %73 = arith.cmpi sge, %43, %72 : vector<16x1xi32>
      %c2_i32_30 = arith.constant 2 : i32
      %74 = vector.broadcast %c2_i32_30 : i32 to vector<16x1xi32>
      %75 = arith.cmpi slt, %43, %74 : vector<16x1xi32>
      %76 = arith.andi %73, %75 : vector<16x1xi1>
      %77 = arith.extui %76 : vector<16x1xi1> to vector<16x1xi32>
      %78 = arith.sitofp %77 : vector<16x1xi32> to vector<16x1xf32>
      %cst_31 = arith.constant 0.000000e+00 : f32
      %79 = vector.broadcast %cst_31 : f32 to vector<48x128xf32>
      %c0_32 = arith.constant 0 : index
      %c0_33 = arith.constant 0 : index
      %80 = vector.load %arg11[%c0_32, %c0_33] : memref<48x128xf32, #tpu.memory_space<vmem>>, vector<48x128xf32>
      tpu.vector_store %arg11[%c0_32, %c0_33], %79 {strides = array<i32>} : memref<48x128xf32, #tpu.memory_space<vmem>>, vector<48x128xf32>,
      %cst_34 = arith.constant 0.000000e+00 : bf16
      %81 = vector.broadcast %cst_34 : bf16 to vector<7x128xbf16>
      %82 = vector.extract_strided_slice %23 {offsets = [1, 0], sizes = [16, 128], strides = [1, 1]} : vector<24x128xf32> to vector<16x128xf32>
      %c16 = arith.constant 16 : index
      %c0_35 = arith.constant 0 : index
      %83 = vector.load %arg11[%c16, %c0_35] : memref<48x128xf32, #tpu.memory_space<vmem>>, vector<16x128xf32>
      tpu.vector_store %arg11[%c16, %c0_35], %82 {strides = array<i32>} : memref<48x128xf32, #tpu.memory_space<vmem>>, vector<16x128xf32>,
      %cst_36 = arith.constant 0.000000e+00 : f32
      %84 = vector.broadcast %cst_36 : f32 to vector<16x128xf32>
      %cst_37 = arith.constant 0.000000e+00 : f32
      %85 = vector.broadcast %cst_37 : f32 to vector<16x128xf32>
      %c6 = arith.constant 6 : index
      %c0_38 = arith.constant 0 : index
      %86 = vector.load %arg11[%c6, %c0_38] : memref<48x128xf32, #tpu.memory_space<vmem>>, vector<16x128xf32>
      %87 = vector.extract_strided_slice %24 {offsets = [0, 0], sizes = [1, 128], strides = [1, 1]} : vector<25x128xf32> to vector<1x128xf32>
      %88 = vector.broadcast %87 : vector<1x128xf32> to vector<16x128xf32>
      %89 = arith.mulf %86, %88 : vector<16x128xf32>
      %90 = arith.addf %85, %89 : vector<16x128xf32>
      %c10 = arith.constant 10 : index
      %c0_39 = arith.constant 0 : index
      %91 = vector.load %arg11[%c10, %c0_39] : memref<48x128xf32, #tpu.memory_space<vmem>>, vector<16x128xf32>
      %92 = vector.extract_strided_slice %24 {offsets = [5, 0], sizes = [1, 128], strides = [1, 1]} : vector<25x128xf32> to vector<1x128xf32>
      %93 = vector.broadcast %92 : vector<1x128xf32> to vector<16x128xf32>
      %94 = arith.mulf %91, %93 : vector<16x128xf32>
      %95 = arith.addf %90, %94 : vector<16x128xf32>
      %c14 = arith.constant 14 : index
      %c0_40 = arith.constant 0 : index
      %96 = vector.load %arg11[%c14, %c0_40] : memref<48x128xf32, #tpu.memory_space<vmem>>, vector<16x128xf32>
      %97 = vector.extract_strided_slice %24 {offsets = [10, 0], sizes = [1, 128], strides = [1, 1]} : vector<25x128xf32> to vector<1x128xf32>
      %98 = vector.broadcast %97 : vector<1x128xf32> to vector<16x128xf32>
      %99 = arith.mulf %96, %98 : vector<16x128xf32>
      %100 = arith.addf %95, %99 : vector<16x128xf32>
      %c18 = arith.constant 18 : index
      %c0_41 = arith.constant 0 : index
      %101 = vector.load %arg11[%c18, %c0_41] : memref<48x128xf32, #tpu.memory_space<vmem>>, vector<16x128xf32>
      %102 = vector.extract_strided_slice %24 {offsets = [15, 0], sizes = [1, 128], strides = [1, 1]} : vector<25x128xf32> to vector<1x128xf32>
      %103 = vector.broadcast %102 : vector<1x128xf32> to vector<16x128xf32>
      %104 = arith.mulf %101, %103 : vector<16x128xf32>
      %105 = arith.addf %100, %104 : vector<16x128xf32>
      %c22 = arith.constant 22 : index
      %c0_42 = arith.constant 0 : index
      %106 = vector.load %arg11[%c22, %c0_42] : memref<48x128xf32, #tpu.memory_space<vmem>>, vector<16x128xf32>
      %107 = vector.extract_strided_slice %24 {offsets = [20, 0], sizes = [1, 128], strides = [1, 1]} : vector<25x128xf32> to vector<1x128xf32>
      %108 = vector.broadcast %107 : vector<1x128xf32> to vector<16x128xf32>
      %109 = arith.mulf %106, %108 : vector<16x128xf32>
      %110 = arith.addf %105, %109 : vector<16x128xf32>
      %111 = vector.broadcast %50 : vector<16x1xf32> to vector<16x128xf32>
      %112 = arith.mulf %110, %111 : vector<16x128xf32>
      %113 = arith.addf %84, %112 : vector<16x128xf32>
      %cst_43 = arith.constant 0.000000e+00 : f32
      %114 = vector.broadcast %cst_43 : f32 to vector<16x128xf32>
      %c7 = arith.constant 7 : index
      %c0_44 = arith.constant 0 : index
      %115 = vector.load %arg11[%c7, %c0_44] : memref<48x128xf32, #tpu.memory_space<vmem>>, vector<16x128xf32>
      %116 = vector.extract_strided_slice %24 {offsets = [1, 0], sizes = [1, 128], strides = [1, 1]} : vector<25x128xf32> to vector<1x128xf32>
      %117 = vector.broadcast %116 : vector<1x128xf32> to vector<16x128xf32>
      %118 = arith.mulf %115, %117 : vector<16x128xf32>
      %119 = arith.addf %114, %118 : vector<16x128xf32>
      %c11 = arith.constant 11 : index
      %c0_45 = arith.constant 0 : index
      %120 = vector.load %arg11[%c11, %c0_45] : memref<48x128xf32, #tpu.memory_space<vmem>>, vector<16x128xf32>
      %121 = vector.extract_strided_slice %24 {offsets = [6, 0], sizes = [1, 128], strides = [1, 1]} : vector<25x128xf32> to vector<1x128xf32>
      %122 = vector.broadcast %121 : vector<1x128xf32> to vector<16x128xf32>
      %123 = arith.mulf %120, %122 : vector<16x128xf32>
      %124 = arith.addf %119, %123 : vector<16x128xf32>
      %c15 = arith.constant 15 : index
      %c0_46 = arith.constant 0 : index
      %125 = vector.load %arg11[%c15, %c0_46] : memref<48x128xf32, #tpu.memory_space<vmem>>, vector<16x128xf32>
      %126 = vector.extract_strided_slice %24 {offsets = [11, 0], sizes = [1, 128], strides = [1, 1]} : vector<25x128xf32> to vector<1x128xf32>
      %127 = vector.broadcast %126 : vector<1x128xf32> to vector<16x128xf32>
      %128 = arith.mulf %125, %127 : vector<16x128xf32>
      %129 = arith.addf %124, %128 : vector<16x128xf32>
      %c19 = arith.constant 19 : index
      %c0_47 = arith.constant 0 : index
      %130 = vector.load %arg11[%c19, %c0_47] : memref<48x128xf32, #tpu.memory_space<vmem>>, vector<16x128xf32>
      %131 = vector.extract_strided_slice %24 {offsets = [16, 0], sizes = [1, 128], strides = [1, 1]} : vector<25x128xf32> to vector<1x128xf32>
      %132 = vector.broadcast %131 : vector<1x128xf32> to vector<16x128xf32>
      %133 = arith.mulf %130, %132 : vector<16x128xf32>
      %134 = arith.addf %129, %133 : vector<16x128xf32>
      %c23 = arith.constant 23 : index
      %c0_48 = arith.constant 0 : index
      %135 = vector.load %arg11[%c23, %c0_48] : memref<48x128xf32, #tpu.memory_space<vmem>>, vector<16x128xf32>
      %136 = vector.extract_strided_slice %24 {offsets = [21, 0], sizes = [1, 128], strides = [1, 1]} : vector<25x128xf32> to vector<1x128xf32>
      %137 = vector.broadcast %136 : vector<1x128xf32> to vector<16x128xf32>
      %138 = arith.mulf %135, %137 : vector<16x128xf32>
      %139 = arith.addf %134, %138 : vector<16x128xf32>
      %140 = vector.broadcast %57 : vector<16x1xf32> to vector<16x128xf32>
      %141 = arith.mulf %139, %140 : vector<16x128xf32>
      %142 = arith.addf %113, %141 : vector<16x128xf32>
      %cst_49 = arith.constant 0.000000e+00 : f32
      %143 = vector.broadcast %cst_49 : f32 to vector<16x128xf32>
      %c8 = arith.constant 8 : index
      %c0_50 = arith.constant 0 : index
      %144 = vector.load %arg11[%c8, %c0_50] : memref<48x128xf32, #tpu.memory_space<vmem>>, vector<16x128xf32>
      %145 = vector.extract_strided_slice %24 {offsets = [2, 0], sizes = [1, 128], strides = [1, 1]} : vector<25x128xf32> to vector<1x128xf32>
      %146 = vector.broadcast %145 : vector<1x128xf32> to vector<16x128xf32>
      %147 = arith.mulf %144, %146 : vector<16x128xf32>
      %148 = arith.addf %143, %147 : vector<16x128xf32>
      %c12 = arith.constant 12 : index
      %c0_51 = arith.constant 0 : index
      %149 = vector.load %arg11[%c12, %c0_51] : memref<48x128xf32, #tpu.memory_space<vmem>>, vector<16x128xf32>
      %150 = vector.extract_strided_slice %24 {offsets = [7, 0], sizes = [1, 128], strides = [1, 1]} : vector<25x128xf32> to vector<1x128xf32>
      %151 = vector.broadcast %150 : vector<1x128xf32> to vector<16x128xf32>
      %152 = arith.mulf %149, %151 : vector<16x128xf32>
      %153 = arith.addf %148, %152 : vector<16x128xf32>
      %c16_52 = arith.constant 16 : index
      %c0_53 = arith.constant 0 : index
      %154 = vector.load %arg11[%c16_52, %c0_53] : memref<48x128xf32, #tpu.memory_space<vmem>>, vector<16x128xf32>
      %155 = vector.extract_strided_slice %24 {offsets = [12, 0], sizes = [1, 128], strides = [1, 1]} : vector<25x128xf32> to vector<1x128xf32>
      %156 = vector.broadcast %155 : vector<1x128xf32> to vector<16x128xf32>
      %157 = arith.mulf %154, %156 : vector<16x128xf32>
      %158 = arith.addf %153, %157 : vector<16x128xf32>
      %c20 = arith.constant 20 : index
      %c0_54 = arith.constant 0 : index
      %159 = vector.load %arg11[%c20, %c0_54] : memref<48x128xf32, #tpu.memory_space<vmem>>, vector<16x128xf32>
      %160 = vector.extract_strided_slice %24 {offsets = [17, 0], sizes = [1, 128], strides = [1, 1]} : vector<25x128xf32> to vector<1x128xf32>
      %161 = vector.broadcast %160 : vector<1x128xf32> to vector<16x128xf32>
      %162 = arith.mulf %159, %161 : vector<16x128xf32>
      %163 = arith.addf %158, %162 : vector<16x128xf32>
      %c24 = arith.constant 24 : index
      %c0_55 = arith.constant 0 : index
      %164 = vector.load %arg11[%c24, %c0_55] : memref<48x128xf32, #tpu.memory_space<vmem>>, vector<16x128xf32>
      %165 = vector.extract_strided_slice %24 {offsets = [22, 0], sizes = [1, 128], strides = [1, 1]} : vector<25x128xf32> to vector<1x128xf32>
      %166 = vector.broadcast %165 : vector<1x128xf32> to vector<16x128xf32>
      %167 = arith.mulf %164, %166 : vector<16x128xf32>
      %168 = arith.addf %163, %167 : vector<16x128xf32>
      %169 = vector.broadcast %64 : vector<16x1xf32> to vector<16x128xf32>
      %170 = arith.mulf %168, %169 : vector<16x128xf32>
      %171 = arith.addf %142, %170 : vector<16x128xf32>
      %cst_56 = arith.constant 0.000000e+00 : f32
      %172 = vector.broadcast %cst_56 : f32 to vector<16x128xf32>
      %c9 = arith.constant 9 : index
      %c0_57 = arith.constant 0 : index
      %173 = vector.load %arg11[%c9, %c0_57] : memref<48x128xf32, #tpu.memory_space<vmem>>, vector<16x128xf32>
      %174 = vector.extract_strided_slice %24 {offsets = [3, 0], sizes = [1, 128], strides = [1, 1]} : vector<25x128xf32> to vector<1x128xf32>
      %175 = vector.broadcast %174 : vector<1x128xf32> to vector<16x128xf32>
      %176 = arith.mulf %173, %175 : vector<16x128xf32>
      %177 = arith.addf %172, %176 : vector<16x128xf32>
      %c13 = arith.constant 13 : index
      %c0_58 = arith.constant 0 : index
      %178 = vector.load %arg11[%c13, %c0_58] : memref<48x128xf32, #tpu.memory_space<vmem>>, vector<16x128xf32>
      %179 = vector.extract_strided_slice %24 {offsets = [8, 0], sizes = [1, 128], strides = [1, 1]} : vector<25x128xf32> to vector<1x128xf32>
      %180 = vector.broadcast %179 : vector<1x128xf32> to vector<16x128xf32>
      %181 = arith.mulf %178, %180 : vector<16x128xf32>
      %182 = arith.addf %177, %181 : vector<16x128xf32>
      %c17 = arith.constant 17 : index
      %c0_59 = arith.constant 0 : index
      %183 = vector.load %arg11[%c17, %c0_59] : memref<48x128xf32, #tpu.memory_space<vmem>>, vector<16x128xf32>
      %184 = vector.extract_strided_slice %24 {offsets = [13, 0], sizes = [1, 128], strides = [1, 1]} : vector<25x128xf32> to vector<1x128xf32>
      %185 = vector.broadcast %184 : vector<1x128xf32> to vector<16x128xf32>
      %186 = arith.mulf %183, %185 : vector<16x128xf32>
      %187 = arith.addf %182, %186 : vector<16x128xf32>
      %c21 = arith.constant 21 : index
      %c0_60 = arith.constant 0 : index
      %188 = vector.load %arg11[%c21, %c0_60] : memref<48x128xf32, #tpu.memory_space<vmem>>, vector<16x128xf32>
      %189 = vector.extract_strided_slice %24 {offsets = [18, 0], sizes = [1, 128], strides = [1, 1]} : vector<25x128xf32> to vector<1x128xf32>
      %190 = vector.broadcast %189 : vector<1x128xf32> to vector<16x128xf32>
      %191 = arith.mulf %188, %190 : vector<16x128xf32>
      %192 = arith.addf %187, %191 : vector<16x128xf32>
      %c25 = arith.constant 25 : index
      %c0_61 = arith.constant 0 : index
      %193 = vector.load %arg11[%c25, %c0_61] : memref<48x128xf32, #tpu.memory_space<vmem>>, vector<16x128xf32>
      %194 = vector.extract_strided_slice %24 {offsets = [23, 0], sizes = [1, 128], strides = [1, 1]} : vector<25x128xf32> to vector<1x128xf32>
      %195 = vector.broadcast %194 : vector<1x128xf32> to vector<16x128xf32>
      %196 = arith.mulf %193, %195 : vector<16x128xf32>
      %197 = arith.addf %192, %196 : vector<16x128xf32>
      %198 = vector.broadcast %71 : vector<16x1xf32> to vector<16x128xf32>
      %199 = arith.mulf %197, %198 : vector<16x128xf32>
      %200 = arith.addf %171, %199 : vector<16x128xf32>
      %cst_62 = arith.constant 0.000000e+00 : f32
      %201 = vector.broadcast %cst_62 : f32 to vector<16x128xf32>
      %c10_63 = arith.constant 10 : index
      %c0_64 = arith.constant 0 : index
      %202 = vector.load %arg11[%c10_63, %c0_64] : memref<48x128xf32, #tpu.memory_space<vmem>>, vector<16x128xf32>
      %203 = vector.extract_strided_slice %24 {offsets = [4, 0], sizes = [1, 128], strides = [1, 1]} : vector<25x128xf32> to vector<1x128xf32>
      %204 = vector.broadcast %203 : vector<1x128xf32> to vector<16x128xf32>
      %205 = arith.mulf %202, %204 : vector<16x128xf32>
      %206 = arith.addf %201, %205 : vector<16x128xf32>
      %c14_65 = arith.constant 14 : index
      %c0_66 = arith.constant 0 : index
      %207 = vector.load %arg11[%c14_65, %c0_66] : memref<48x128xf32, #tpu.memory_space<vmem>>, vector<16x128xf32>
      %208 = vector.extract_strided_slice %24 {offsets = [9, 0], sizes = [1, 128], strides = [1, 1]} : vector<25x128xf32> to vector<1x128xf32>
      %209 = vector.broadcast %208 : vector<1x128xf32> to vector<16x128xf32>
      %210 = arith.mulf %207, %209 : vector<16x128xf32>
      %211 = arith.addf %206, %210 : vector<16x128xf32>
      %c18_67 = arith.constant 18 : index
      %c0_68 = arith.constant 0 : index
      %212 = vector.load %arg11[%c18_67, %c0_68] : memref<48x128xf32, #tpu.memory_space<vmem>>, vector<16x128xf32>
      %213 = vector.extract_strided_slice %24 {offsets = [14, 0], sizes = [1, 128], strides = [1, 1]} : vector<25x128xf32> to vector<1x128xf32>
      %214 = vector.broadcast %213 : vector<1x128xf32> to vector<16x128xf32>
      %215 = arith.mulf %212, %214 : vector<16x128xf32>
      %216 = arith.addf %211, %215 : vector<16x128xf32>
      %c22_69 = arith.constant 22 : index
      %c0_70 = arith.constant 0 : index
      %217 = vector.load %arg11[%c22_69, %c0_70] : memref<48x128xf32, #tpu.memory_space<vmem>>, vector<16x128xf32>
      %218 = vector.extract_strided_slice %24 {offsets = [19, 0], sizes = [1, 128], strides = [1, 1]} : vector<25x128xf32> to vector<1x128xf32>
      %219 = vector.broadcast %218 : vector<1x128xf32> to vector<16x128xf32>
      %220 = arith.mulf %217, %219 : vector<16x128xf32>
      %221 = arith.addf %216, %220 : vector<16x128xf32>
      %c26 = arith.constant 26 : index
      %c0_71 = arith.constant 0 : index
      %222 = vector.load %arg11[%c26, %c0_71] : memref<48x128xf32, #tpu.memory_space<vmem>>, vector<16x128xf32>
      %223 = vector.extract_strided_slice %24 {offsets = [24, 0], sizes = [1, 128], strides = [1, 1]} : vector<25x128xf32> to vector<1x128xf32>
      %224 = vector.broadcast %223 : vector<1x128xf32> to vector<16x128xf32>
      %225 = arith.mulf %222, %224 : vector<16x128xf32>
      %226 = arith.addf %221, %225 : vector<16x128xf32>
      %227 = vector.broadcast %78 : vector<16x1xf32> to vector<16x128xf32>
      %228 = arith.mulf %226, %227 : vector<16x128xf32>
      %229 = arith.addf %200, %228 : vector<16x128xf32>
      %230 = vector.broadcast %25 : vector<1x128xf32> to vector<16x128xf32>
      %231 = arith.mulf %229, %230 : vector<16x128xf32>
      %232 = vector.broadcast %26 : vector<1x128xf32> to vector<16x128xf32>
      %233 = arith.addf %231, %232 : vector<16x128xf32>
      %cst_72 = arith.constant 3.000000e+00 : f32
      %234 = vector.broadcast %cst_72 : f32 to vector<16x128xf32>
      %235 = arith.addf %233, %234 : vector<16x128xf32>
      %cst_73 = arith.constant 0.000000e+00 : f32
      %cst_74 = arith.constant 6.000000e+00 : f32
      %236 = vector.broadcast %cst_73 : f32 to vector<16x128xf32>
      %237 = arith.maximumf %236, %235 : vector<16x128xf32>
      %238 = vector.broadcast %cst_74 : f32 to vector<16x128xf32>
      %239 = arith.minimumf %238, %237 : vector<16x128xf32>
      %240 = arith.mulf %233, %239 : vector<16x128xf32>
      %cst_75 = arith.constant 0.166666672 : f32
      %241 = vector.broadcast %cst_75 : f32 to vector<16x128xf32>
      %242 = arith.mulf %240, %241 : vector<16x128xf32>
      %243 = vector.extract_strided_slice %23 {offsets = [0, 0], sizes = [1, 128], strides = [1, 1]} : vector<24x128xf32> to vector<1x128xf32>
      %244 = arith.truncf %243 : vector<1x128xf32> to vector<1x128xbf16>
      %c0_76 = arith.constant 0 : index
      %c0_77 = arith.constant 0 : index
      %245 = vector.load %arg9[%c0_76, %c0_77] : memref<24x128xbf16, #tpu.memory_space<vmem>>, vector<1x128xbf16>
      tpu.vector_store %arg9[%c0_76, %c0_77], %244 {strides = array<i32>} : memref<24x128xbf16, #tpu.memory_space<vmem>>, vector<1x128xbf16>,
      %246 = arith.truncf %242 : vector<16x128xf32> to vector<16x128xbf16>
      %c1 = arith.constant 1 : index
      %c0_78 = arith.constant 0 : index
      %247 = vector.load %arg9[%c1, %c0_78] : memref<24x128xbf16, #tpu.memory_space<vmem>>, vector<16x128xbf16>
      tpu.vector_store %arg9[%c1, %c0_78], %246 {strides = array<i32>} : memref<24x128xbf16, #tpu.memory_space<vmem>>, vector<16x128xbf16>,
      %c17_79 = arith.constant 17 : index
      %c0_80 = arith.constant 0 : index
      %248 = vector.load %arg9[%c17_79, %c0_80] : memref<24x128xbf16, #tpu.memory_space<vmem>>, vector<7x128xbf16>
      tpu.vector_store %arg9[%c17_79, %c0_80], %81 {strides = array<i32>} : memref<24x128xbf16, #tpu.memory_space<vmem>>, vector<7x128xbf16>,
    } else {
    }
    return
  }
  func.func @transform_0(%arg0: i32, %arg1: i32, %arg2: i32) -> (i32, i32) {
    %c0_i32 = arith.constant 0 : i32
    return %arg0, %arg2 : i32, i32
  }
  func.func @transform_1(%arg0: i32, %arg1: i32, %arg2: i32) -> (i32, i32) {
    %c0_i32 = arith.constant 0 : i32
    return %arg2, %arg1 : i32, i32
  }
  func.func @transform_2(%arg0: i32, %arg1: i32, %arg2: i32) -> (i32, i32) {
    %c0_i32 = arith.constant 0 : i32
    %c0_i32_0 = arith.constant 0 : i32
    return %c0_i32, %arg1 : i32, i32
  }
  func.func @transform_3(%arg0: i32, %arg1: i32, %arg2: i32) -> (i32, i32) {
    %c0_i32 = arith.constant 0 : i32
    %c0_i32_0 = arith.constant 0 : i32
    return %c0_i32, %arg1 : i32, i32
  }
  func.func @transform_4(%arg0: i32, %arg1: i32, %arg2: i32) -> (i32, i32) {
    %c0_i32 = arith.constant 0 : i32
    %c0_i32_0 = arith.constant 0 : i32
    return %c0_i32, %arg1 : i32, i32
  }
  func.func @transform_5(%arg0: i32, %arg1: i32, %arg2: i32) -> (i32, i32) {
    %c0_i32 = arith.constant 0 : i32
    %c0_i32_0 = arith.constant 0 : i32
    return %c0_i32, %arg1 : i32, i32
  }
  func.func @transform_6(%arg0: i32, %arg1: i32, %arg2: i32) -> (i32, i32) {
    %c0_i32 = arith.constant 0 : i32
    return %arg0, %arg1 : i32, i32
  }
}

module attributes {stable_mosaic.version = 11 : i64} {
  func.func @_linear_kernel(%arg0: i32, %arg1: i32, %arg2: i32, %arg3: memref<24x128xbf16, #tpu.memory_space<vmem>>, %arg4: memref<128x128xbf16, #tpu.memory_space<vmem>>, %arg5: memref<1x128xf32, #tpu.memory_space<vmem>>, %arg6: memref<24x128xf32, #tpu.memory_space<vmem>>, %arg7: memref<24x128xf32, #tpu.memory_space<vmem>>) attributes {dimension_semantics = [#tpu.dimension_semantics<parallel>, #tpu.dimension_semantics<parallel>, #tpu.dimension_semantics<arbitrary>], iteration_bounds = array<i64: 2, 1, 1>, scalar_prefetch = 0 : i64, scratch_operands = 1 : i64, tpu.core_type = #tpu.core_type<tc>, window_params = [{transform_indices = @transform_0, window_bounds = array<i64: 24, 128>}, {transform_indices = @transform_1, window_bounds = array<i64: 128, 128>}, {transform_indices = @transform_2, window_bounds = array<i64: 1, 128>}, {transform_indices = @transform_3, window_bounds = array<i64: 24, 128>}]} {
    %c0_i32 = arith.constant 0 : i32
    %0 = arith.cmpi eq, %arg2, %c0_i32 : i32
    %1 = arith.extui %0 : i1 to i32
    %c0_i32_0 = arith.constant 0 : i32
    %2 = arith.cmpi ne, %1, %c0_i32_0 : i32
    scf.if %2 {
      %cst_10 = arith.constant 0.000000e+00 : f32
      %12 = vector.broadcast %cst_10 : f32 to vector<24x128xf32>
      %c0_11 = arith.constant 0 : index
      %c0_12 = arith.constant 0 : index
      %13 = vector.load %arg7[%c0_11, %c0_12] : memref<24x128xf32, #tpu.memory_space<vmem>>, vector<24x128xf32>
      tpu.vector_store %arg7[%c0_11, %c0_12], %12 {strides = array<i32>} : memref<24x128xf32, #tpu.memory_space<vmem>>, vector<24x128xf32>,
    } else {
    }
    %c0 = arith.constant 0 : index
    %c0_1 = arith.constant 0 : index
    %3 = vector.load %arg7[%c0, %c0_1] : memref<24x128xf32, #tpu.memory_space<vmem>>, vector<24x128xf32>
    %c0_2 = arith.constant 0 : index
    %c0_3 = arith.constant 0 : index
    %4 = vector.load %arg3[%c0_2, %c0_3] : memref<24x128xbf16, #tpu.memory_space<vmem>>, vector<24x128xbf16>
    %c0_4 = arith.constant 0 : index
    %c0_5 = arith.constant 0 : index
    %5 = vector.load %arg4[%c0_4, %c0_5] : memref<128x128xbf16, #tpu.memory_space<vmem>>, vector<128x128xbf16>
    %cst = arith.constant dense<0.000000e+00> : vector<24x128xf32>
    %6 = tpu.matmul %4, %5, %cst {dimension_numbers = #tpu.dot_dimension_numbers<[1], [0], [0], [1], [0, 0, 1, 1], [], []>} : vector<24x128xbf16>, vector<128x128xbf16>, vector<24x128xf32> -> vector<24x128xf32>
    %7 = arith.addf %3, %6 : vector<24x128xf32>
    %c0_6 = arith.constant 0 : index
    %c0_7 = arith.constant 0 : index
    %8 = vector.load %arg7[%c0_6, %c0_7] : memref<24x128xf32, #tpu.memory_space<vmem>>, vector<24x128xf32>
    tpu.vector_store %arg7[%c0_6, %c0_7], %7 {strides = array<i32>} : memref<24x128xf32, #tpu.memory_space<vmem>>, vector<24x128xf32>,
    %c0_i32_8 = arith.constant 0 : i32
    %9 = arith.cmpi eq, %arg2, %c0_i32_8 : i32
    %10 = arith.extui %9 : i1 to i32
    %c0_i32_9 = arith.constant 0 : i32
    %11 = arith.cmpi ne, %10, %c0_i32_9 : i32
    scf.if %11 {
      %c0_10 = arith.constant 0 : index
      %c0_11 = arith.constant 0 : index
      %12 = vector.load %arg7[%c0_10, %c0_11] : memref<24x128xf32, #tpu.memory_space<vmem>>, vector<24x128xf32>
      %c0_12 = arith.constant 0 : index
      %c0_13 = arith.constant 0 : index
      %13 = vector.load %arg5[%c0_12, %c0_13] : memref<1x128xf32, #tpu.memory_space<vmem>>, vector<1x128xf32>
      %14 = vector.broadcast %13 : vector<1x128xf32> to vector<24x128xf32>
      %15 = arith.addf %12, %14 : vector<24x128xf32>
      %c0_14 = arith.constant 0 : index
      %c0_15 = arith.constant 0 : index
      %16 = vector.load %arg6[%c0_14, %c0_15] : memref<24x128xf32, #tpu.memory_space<vmem>>, vector<24x128xf32>
      tpu.vector_store %arg6[%c0_14, %c0_15], %15 {strides = array<i32>} : memref<24x128xf32, #tpu.memory_space<vmem>>, vector<24x128xf32>,
    } else {
    }
    return
  }
  func.func @transform_0(%arg0: i32, %arg1: i32, %arg2: i32) -> (i32, i32) {
    %c0_i32 = arith.constant 0 : i32
    return %arg0, %arg2 : i32, i32
  }
  func.func @transform_1(%arg0: i32, %arg1: i32, %arg2: i32) -> (i32, i32) {
    %c0_i32 = arith.constant 0 : i32
    return %arg2, %arg1 : i32, i32
  }
  func.func @transform_2(%arg0: i32, %arg1: i32, %arg2: i32) -> (i32, i32) {
    %c0_i32 = arith.constant 0 : i32
    %c0_i32_0 = arith.constant 0 : i32
    return %c0_i32, %arg1 : i32, i32
  }
  func.func @transform_3(%arg0: i32, %arg1: i32, %arg2: i32) -> (i32, i32) {
    %c0_i32 = arith.constant 0 : i32
    return %arg0, %arg1 : i32, i32
  }
}

</mosaic_0001>

<bundles_post_ra>
// kernel: dwmlp_forward.3
= control target key start
LH: loop header
LB: loop body
LE: loop exit
PB: predicated region body
PF: predicated region fallthrough
CT: control target
= control target key end

     0   :  { %s661_s12 = smov 0   ;;  %s663_s13 = smov 0   ;;  %s725_s0 = inlined_call_operand.vmem [shape: bf16[48,128], index: 0, kind: input, shape index: {}]   ;;  %s726_s1 = inlined_call_operand.vmem [shape: bf16[128,128], index: 1, kind: input, shape index: {}]   ;;  %s727_s2 = inlined_call_operand.vmem [shape: f32[1,128], index: 2, kind: input, shape index: {}]   ;;  %s728_s3 = inlined_call_operand.vmem [shape: f32[48,128], index: 3, kind: output, shape index: {}]  }
   0x1   :  { %s665_s14 = smov 0  }
   0x2 LB: > { %s32_s15 = sadd.s32 1, %s635_s13  ;;  %p537_p0 = scmp.ge.s32.totalorder %s639_s14, 1  ;;  %s639_s14 = sphi %s665_s14, %s13_s14   ;;  %s635_s13 = sphi %s663_s13, %s730_s13   ;;  %s631_s12 = sphi %s661_s12, %s729_s12  }
   0x3   : > { %p34_p1 = scmp.ge.s32.totalorder %s32_s15, 2  ;;  %p188_p2 = scmp.lt.s32.totalorder %s639_s14, 3 }
   0x5   : > { %s732_s15 = smov (%p34_p1, %s32_s15), 0  ;;  %p189_p3 = pnand %p537_p0, %p188_p2 }
   0x6   : > { %s229_s18 = smul.u32 (!%p189_p3), 3, %s631_s12 }
   0x7   : > { %192 = sbr.rel (%p189_p3) target bundleno = 247 (0xf7), region = 32 }
   0x8   : > { %p230_p4 = scmp.lt.s32.totalorder (!%p189_p3), %s229_s18, 5 }
   0xc   : > { %v607_v0 = vld [vmem:[%s726_s1 + $0x38] sm:$0xff]   ;;  %v608_v1 = vld [vmem:[%s726_s1 + $0x30] sm:$0xff]   ;;  %v609_v2 = vld [vmem:[%s726_s1 + $0x28] sm:$0xff]   ;;  %s734_s18 = smov (!%p230_p4, %s229_s18), 5 }
   0xd   : > { %563 = vmatprep.subr.bf16.mxu0 %v607_v0  ;;  %s538_s23 = sshll.u32 %s734_s18, 2  ;;  %v610_v3 = vld [vmem:[%s726_s1 + $0x20] sm:$0xff]   ;;  %v611_v5 = vld [vmem:[%s726_s1 + $0x18] sm:$0xff]   ;;  %v612_v6 = vld [vmem:[%s726_s1 + $0x10] sm:$0xff]   ;;  %s539_s10 = sshll.u32 %s734_s18, 3 }
   0xe   : > { %564 = vmatpush3.bf16.msra.mxu0 %v607_v0  ;;  %s236_s28 = scalar_lea.vmem %s725_s0, %s538_s23  ;;  %v613_v7 = vld [vmem:[%s726_s1 + $0x8] sm:$0xff]   ;;  %v614_v8 = vld [vmem:[%s726_s1] sm:$0xff]   ;;  %s257_s19 = scalar_lea.vmem %s728_s3, %s539_s10 }
   0xf   : > { %565 = vmatprep.subr.bf16.mxu0 %v608_v1  ;;  %v615_v4 = vld [vmem:[%s236_s28] sm:$0xff]   ;;  %v616_v9 = vld [vmem:[%s236_s28 + $0x8] ss:$0 sps:$4 sm:$0xff]  }
  0x10   : > { %579 = vmatprep.mubr.bf16.mxu0 %v615_v4  ;;  %v550_v11 = vld [vmem:[%s727_s2] ss:$0 sm:$0xff] }
  0x12   : > { %566 = vmatpush3.bf16.msra.mxu0 %v608_v1 }
  0x13   : > { %567 = vmatprep.subr.bf16.mxu0 %v609_v2 }
  0x16   : > { %568 = vmatpush3.bf16.msra.mxu0 %v609_v2 }
  0x17   : > { %569 = vmatprep.subr.bf16.mxu0 %v610_v3 }
  0x1a   : > { %570 = vmatpush3.bf16.msra.mxu0 %v610_v3 }
  0x1b   : > { %571 = vmatprep.subr.bf16.mxu0 %v611_v5 }
  0x1e   : > { %572 = vmatpush3.bf16.msra.mxu0 %v611_v5 }
  0x1f   : > { %573 = vmatprep.subr.bf16.mxu0 %v612_v6 }
  0x22   : > { %574 = vmatpush3.bf16.msra.mxu0 %v612_v6 }
  0x23   : > { %575 = vmatprep.subr.bf16.mxu0 %v613_v7 }
  0x26   : > { %576 = vmatpush3.bf16.msra.mxu0 %v613_v7 }
  0x27   : > { %577 = vmatprep.subr.bf16.mxu0 %v614_v8 }
  0x2a   : > { %578 = vmatpush3.bf16.msra.mxu0 %v614_v8 }
  0x2d   : > { %580 = vmatmul.mubr.bf16.vlgmr.msra.gmra.mxu0 %v616_v9 }
  0xed   : > { %v581_v10 = vpop.f32.mrf.mxu0 }
  0xee   : > { %v416_v17 = vadd.f32 %v581_v10, %v550_v11 }
  0xef   : > { %v381_v12 = vpop.f32.mrf.mxu0 }
  0xf0   : > { %v414_v13 = vadd.f32 %v550_v11, %v381_v12  ;;  %419 = vst [vmem:[%s257_s19 + $0x10] sm:$0xff] %v416_v17 }
  0xf1   : > { %v582_v14 = vpop.f32.mrf.mxu0 }
  0xf2   : > { %417 = vst [vmem:[%s257_s19] sm:$0xff] %v414_v13 }
  0xf3   : > { %v384_v15 = vpop.f32.mrf.mxu0 }
  0xf4   : > { %v415_v16 = vadd.f32 %v550_v11, %v384_v15 }
  0xf6   : > { %418 = vst [vmem:[%s257_s19 + $0x8] sm:$0xff] %v415_v16 }
  0xf7 PF: > { %s13_s14 = sadd.s32 1, %s639_s14   ;;  %s729_s12 = smov %s635_s13 }
  0xf8   : > { %p10_p5 = scmp.ge.s32.totalorder %s13_s14, 4   ;;  %s730_s13 = smov %s732_s15 }
  0xfa   :  { %12 = sbr.rel (!%p10_p5) target bundleno = 2 (0x2), region = 76 }

// kernel: dwmlp_forward.2
= control target key start
LH: loop header
LB: loop body
LE: loop exit
PB: predicated region body
PF: predicated region fallthrough
CT: control target
= control target key end

     0   :  { %s1294_s21 = smov 0   ;;  %s1296_s22 = smov 0   ;;  %s1625_s0 = inlined_call_operand.vmem [shape: bf16[48,128], index: 0, kind: input, shape index: {}]   ;;  %s1626_s1 = inlined_call_operand.vmem [shape: bf16[128,128], index: 1, kind: input, shape index: {}]   ;;  %s1627_s2 = inlined_call_operand.vmem [shape: f32[1,128], index: 2, kind: input, shape index: {}]   ;;  %s1628_s3 = inlined_call_operand.vmem [shape: f32[25,128], index: 3, kind: input, shape index: {}]   ;;  %s1629_s4 = inlined_call_operand.vmem [shape: f32[1,128], index: 4, kind: input, shape index: {}]   ;;  %s1630_s5 = inlined_call_operand.vmem [shape: f32[1,128], index: 5, kind: input, shape index: {}]   ;;  %s1631_s6 = inlined_call_operand.vmem [shape: bf16[48,128], index: 6, kind: output, shape index: {}]  }
   0x1   :  { %s1298_s23 = smov 0  }
   0x2 LB: > { %s35_s24 = sadd.s32 1, %s1252_s22  ;;  %p1132_p0 = scmp.ge.s32.totalorder %s1256_s23, 1  ;;  %s1256_s23 = sphi %s1298_s23, %s16_s23   ;;  %s1252_s22 = sphi %s1296_s22, %s1647_s22   ;;  %s1248_s21 = sphi %s1294_s21, %s1646_s21  }
   0x3   : > { %p37_p1 = scmp.ge.s32.totalorder %s35_s24, 2  ;;  %p288_p2 = scmp.lt.s32.totalorder %s1256_s23, 3 }
   0x5   : > { %s1649_s24 = smov (%p37_p1, %s35_s24), 0  ;;  %p289_p3 = pnand %p1132_p0, %p288_p2 }
   0x7   : > { %292 = sbr.rel (%p289_p3) target bundleno = 336 (0x150), region = 44 }
   0xc   : > { %v1218_v0 = vld [vmem:[%s1626_s1 + $0x38] sm:$0xff]   ;;  %s345_s27 = smul.u32 3, %s1248_s21  ;;  %v1219_v1 = vld [vmem:[%s1626_s1 + $0x30] sm:$0xff]   ;;  %v1220_v2 = vld [vmem:[%s1626_s1 + $0x28] sm:$0xff]   ;;  %v1632_v10 = vmov 0.0   ;;  %v564_v19 = vlaneseq  ;;  %vm926_vm0 = vcmask 1040384  }
   0xd   : > { %1173 = vmatprep.subr.bf16.mxu0 %v1218_v0  ;;  %v1221_v3 = vld [vmem:[%s1626_s1 + $0x20] sm:$0xff]   ;;  %v1222_v5 = vld [vmem:[%s1626_s1 + $0x18] sm:$0xff]   ;;  %v1223_v6 = vld [vmem:[%s1626_s1 + $0x10] sm:$0xff]   ;;  %644 = vst [vmem:[#allocation3 + $0x18] sm:$0xff] %v1632_v10  ;;  %vm927_vm1 = vsmask.f32 256 }
   0xe   : > { %p346_p4 = scmp.lt.s32.totalorder %s345_s27, 5  ;;  %1174 = vmatpush3.bf16.msra.mxu0 %v1218_v0  ;;  %v1224_v7 = vld [vmem:[%s1626_s1 + $0x8] sm:$0xff]   ;;  %v1225_v8 = vld [vmem:[%s1626_s1] sm:$0xff]   ;;  %645 = vst [vmem:[#allocation3 + $0x20] sm:$0xff] %v1632_v10  ;;  %641 = vst [vmem:[#allocation3] sm:$0xff] %v1632_v10  ;;  %v565_v23 = vshrl.u32 %v564_v19, 7 }
   0xf   : > { %1175 = vmatprep.subr.bf16.mxu0 %v1219_v1  ;;  %642 = vst [vmem:[#allocation3 + $0x8] sm:$0xff] %v1632_v10  ;;  %643 = vst [vmem:[#allocation3 + $0x10] sm:$0xff] %v1632_v10  ;;  %v1145_v11 = vld [vmem:[%s1627_s2] ss:$0 sm:$0xff]  ;;  %v1358_v25 = vld [vmem:[%s1628_s3 + $0x10] sm:$0xff]  ;;  %v1635_v62 = vmov 0 }
  0x10   : > { %s1651_s27 = smov (!%p346_p4, %s345_s27), 5  ;;  %646 = vst [vmem:[#allocation3 + $0x28] sm:$0xff] %v1632_v10  ;;  %v1353_v24 = vsub.s32 5, %v565_v23  ;;  %v654_v26 = vsub.s32 0, %v565_v23  ;;  %v1360_v27 = vsub.s32 3, %v565_v23  ;;  %v558_v28 = vld [vmem:[%s1628_s3] sm:$0xff]  ;;  %vm1426_vm2 = vmand %vm926_vm0, %vm927_vm1 }
  0x11   : > { %s1133_s8 = sshll.u32 %s1651_s27, 2  ;;  %v1368_v29 = vld [vmem:[%s1628_s3 + $0x8] sm:$0xff]  ;;  %v705_v30 = vsub.s32 1, %v565_v23  ;;  %v1374_v33 = vsub.s32 2, %v565_v23  ;;  %v1376_v34 = vsub.s32 7, %v565_v23  ;;  %v1378_v37 = vsub.s32 6, %v565_v23 }
  0x12   : > { %1176 = vmatpush3.bf16.msra.mxu0 %v1219_v1  ;;  %s352_s13 = scalar_lea.vmem %s1625_s0, %s1133_s8  ;;  %v1372_v32 = vrot.slane %v1358_v25, %v1353_v24  ;;  %v566_v38 = vadd.s32 8, %v565_v23  ;;  %v1380_v40 = vrot.slane %v558_v28, %v654_v26  ;;  %v691_v41 = vsub.s32 4, %v565_v23 }
  0x13   : > { %1177 = vmatprep.subr.bf16.mxu0 %v1220_v2  ;;  %v1226_v4 = vld [vmem:[%s352_s13] sm:$0xff]   ;;  %v1227_v9 = vld [vmem:[%s352_s13 + $0x8] ss:$0 sps:$4 sm:$0xff]   ;;  %v1384_v42 = vrot.slane %v1368_v29, %v1360_v27  ;;  %s1391_s13 = scalar_lea.vmem %s1631_s6, %s1133_s8  ;;  %v1393_v47 = vrot.slane %v558_v28, %v705_v30  ;;  %v1396_v48 = vrot.slane %v558_v28, %v1353_v24  ;;  %v1400_v49 = vrot.slane %v1368_v29, %v1374_v33 }
  0x14   : > { %1189 = vmatprep.mubr.bf16.mxu0 %v1226_v4  ;;  %v1403_v51 = vrot.slane %v558_v28, %v1374_v33  ;;  %v1405_v52 = vand.u32 3, %v565_v23  ;;  %v1408_v54 = vrot.slane %v558_v28, %v1378_v37  ;;  %v1411_v55 = vrot.slane %v558_v28, %v1376_v34  ;;  %v929_v63 = vld [vmem:[%s1391_s13] sm:$0x1] }
  0x15   : > { %v1413_v56 = vand.u32 3, %v566_v38  ;;  %v1417_v59 = vrot.slane %v558_v28, %v1360_v27  ;;  %v1420_v60 = vrot.slane %v1368_v29, %v654_v26  ;;  %v1422_v61 = vrot.slane %v558_v28, %v691_v41 }
  0x16   : > { %1178 = vmatpush3.bf16.msra.mxu0 %v1220_v2  ;;  %v650_v46 = vld [vmem:[#allocation3 + $0x6] sm:$0xff]  ;;  %v1636_v62 = vsel %vm1426_vm2, 4294967295, %v1635_v62  ;;  %v758_v4 = vmul.f32 0.0, %v1403_v51  ;;  %vm591_vm3 = vcmp.ge.s32.totalorder %v1405_v52, 2  ;;  %vm601_vm4 = vcmp.ge.s32.totalorder %v1405_v52, 1 }
  0x17   : > { %1179 = vmatprep.subr.bf16.mxu0 %v1221_v3  ;;  %v701_v50 = vld [vmem:[#allocation3 + $0x7] sm:$0xff]  ;;  %v656_v58 = vmul.f32 %v1380_v40, %v650_v46  ;;  %1637 = vst [vmem:[#allocation4_spill] sm:$0xff] %v1636_v62  ;;  %vm592_vm5 = vcmp.ge.s32.totalorder %v1413_v56, 2  ;;  %vm623_vm6 = vcmp.lt.s32.totalorder %v1405_v52, 3  ;;  %vm602_vm7 = vcmp.ge.s32.totalorder %v1413_v56, 1 }
  0x18   : > { %v707_v0 = vmul.f32 %v1393_v47, %v701_v50  ;;  %vm624_vm8 = vcmp.lt.s32.totalorder %v1413_v56, 3  ;;  %v841_v19 = vld [vmem:[#allocation3 + $0x21] sm:$0xff]  ;;  %v1483_v23 = vrot.slane %v1368_v29, %v1353_v24  ;;  %v1498_v38 = vrot.slane %v1368_v29, %v1378_v37 }
  0x19   : > { %v1502_v24 = vrot.slane %v1358_v25, %v1360_v27  ;;  %vm633_vm9 = vcmp.lt.s32.totalorder %v1405_v52, 2  ;;  %vm634_vm10 = vcmp.lt.s32.totalorder %v1413_v56, 2  ;;  %v1156_v52 = vld [vmem:[%s1630_s5] ss:$0 sm:$0xff]  ;;  %vm960_vm11 = vcmask 1043456  }
  0x1a   : > { %1180 = vmatpush3.bf16.msra.mxu0 %v1221_v3  ;;  %vm961_vm12 = vsmask.f32 7938  ;;  %vm938_vm13 = vsmask.f32 4368 }
  0x1b   : > { %1181 = vmatprep.subr.bf16.mxu0 %v1222_v5  ;;  %vm1598_vm14 = vmand %vm960_vm11, %vm961_vm12 }
  0x1c   : > { %vm939_vm15 = vmor %vm927_vm1, %vm938_vm13 }
  0x1e   : > { %1182 = vmatpush3.bf16.msra.mxu0 %v1222_v5  ;;  %v1434_v5 = vrot.slane %v1368_v29, %v705_v30 }
  0x1f   : > { %1183 = vmatprep.subr.bf16.mxu0 %v1223_v6 }
  0x22   : > { %1184 = vmatpush3.bf16.msra.mxu0 %v1223_v6 }
  0x23   : > { %1185 = vmatprep.subr.bf16.mxu0 %v1224_v7 }
  0x26   : > { %1186 = vmatpush3.bf16.msra.mxu0 %v1224_v7 }
  0x27   : > { %1187 = vmatprep.subr.bf16.mxu0 %v1225_v8 }
  0x2a   : > { %1188 = vmatpush3.bf16.msra.mxu0 %v1225_v8  ;;  %v683_v8 = vrot.slane %v1368_v29, %v1376_v34 }
  0x2d   : > { %1190 = vmatmul.mubr.bf16.vlgmr.msra.gmra.mxu0 %v1227_v9  ;;  %v692_v9 = vrot.slane %v1358_v25, %v691_v41 }
  0xed   : > { %v1191_v12 = vpop.f32.mrf.mxu0 }
  0xee   : > { %v542_v13 = vadd.f32 %v1191_v12, %v1145_v11  ;;  %v1452_v12 = vrot.slane %v1358_v25, %v654_v26  ;;  %v1487_v26 = vrot.slane %v1358_v25, %v1376_v34 }
  0xef   : > { %v507_v14 = vpop.f32.mrf.mxu0 }
  0xf0   : > { %v548_v15 = vmul.f32 0.70710677, %v542_v13  ;;  %v540_v16 = vadd.f32 %v1145_v11, %v507_v14  ;;  %v545_v35 = vmul.f32 0.5, %v542_v13  ;;  %v1455_v13 = vrot.slane %v1368_v29, %v691_v41 }
  0xf1   : > { %v1192_v17 = vpop.f32.mrf.mxu0  ;;  %v1458_v14 = vrot.slane %v1358_v25, %v705_v30 }
  0xf2   : > { %1228 = verf.f32 %v548_v15  ;;  %v546_v18 = vmul.f32 0.70710677, %v540_v16  ;;  %v543_v44 = vmul.f32 0.5, %v540_v16  ;;  %v1461_v15 = vsel %vm592_vm5, 1.0, %v1632_v10 }
  0xf3   : > { %v510_v20 = vpop.f32.mrf.mxu0  ;;  %v1466_v16 = vsel %vm601_vm4, 1.0, %v1632_v10  ;;  %v1469_v17 = vsel %vm623_vm6, 1.0, %v1632_v10 }
  0xf4   : > { %1230 = verf.f32 %v546_v18  ;;  %v541_v21 = vadd.f32 %v1145_v11, %v510_v20  ;;  %v1449_v11 = vsel %vm591_vm3, 1.0, %v1632_v10  ;;  %1638 = vst [vmem:[#allocation5_spill] sm:$0xff] %v1469_v17  ;;  %v1473_v18 = vrot.slane %v1358_v25, %v1378_v37 }
  0xf6   : > { %v547_v22 = vmul.f32 0.70710677, %v541_v21  ;;  %v544_v2 = vmul.f32 0.5, %v541_v21  ;;  %v1476_v21 = vsel %vm602_vm7, 1.0, %v1632_v10 }
  0xf8   : > { %1232 = verf.f32 %v547_v22  ;;  %v1479_v22 = vsel %vm624_vm8, 1.0, %v1632_v10 }
  0xf9   : > { %1639 = vst [vmem:[#allocation6_spill] sm:$0xff] %v1479_v22 }
  0xff   : > { %v1229_v31 = vpop.eup %1228 }
 0x100   : > { %v554_v36 = vadd.f32 1.0, %v1229_v31 }
 0x101   : > { %v1231_v39 = vpop.eup %1230 }
 0x102   : > { %v557_v43 = vmul.f32 %v554_v36, %v545_v35  ;;  %v552_v45 = vadd.f32 1.0, %v1231_v39  ;;  %v1490_v35 = vmul.f32 0.0, %v1473_v18  ;;  %v1494_v36 = vrot.slane %v1358_v25, %v1374_v33 }
 0x103   : > { %v1508_v33 = vmul.f32 %v1487_v26, %v841_v19 }
 0x104   : > { %649 = vst [vmem:[#allocation3 + $0x1f] sm:$0x1] %v557_v43  ;;  %v555_v53 = vmul.f32 %v552_v45, %v543_v44 }
 0x105   : > { %v1233_v57 = vpop.eup %1232 }
 0x106   : > { %647 = vst [vmem:[#allocation3 + $0xf] sm:$0xfe] %v555_v53  ;;  %v925_v1 = vpack.c.bf16 %v555_v53, %v555_v53  ;;  %v553_v3 = vadd.f32 1.0, %v1233_v57 }
 0x108   : > { %v930_v6 = vsel %vm1426_vm2, %v925_v1, %v929_v63  ;;  %v556_v7 = vmul.f32 %v553_v3, %v544_v2 }
 0x109   : > { %931 = vst [vmem:[%s1391_s13] sm:$0x1] %v930_v6 }
 0x10a   : > { %648 = vst [vmem:[#allocation3 + $0x17] sm:$0xff] %v556_v7  ;;  %v727_v44 = vmul.f32 %v1384_v42, %v556_v7  ;;  %v744_v45 = vmul.f32 %v1372_v32, %v556_v7 }
 0x10b   : > { %v739_v20 = vld [vmem:[#allocation3 + $0x1f] sm:$0xff] }
 0x10c   : > { %v1511_v46 = vmul.f32 %v1372_v32, %v739_v20 }
 0x10d   : > { %v651_v28 = vld [vmem:[#allocation3 + $0xe] sm:$0xff] }
 0x10e   : > { %v660_v30 = vld [vmem:[#allocation3 + $0xa] sm:$0xff]  ;;  %v657_v29 = vmul.f32 %v1380_v40, %v651_v28  ;;  %v675_v53 = vmul.f32 %v1400_v49, %v651_v28 }
 0x10f   : > { %v702_v31 = vld [vmem:[#allocation3 + $0xf] sm:$0xff]  ;;  %v666_v34 = vmul.f32 %v1396_v48, %v660_v30  ;;  %v1522_v3 = vmul.f32 %v1422_v61, %v660_v30 }
 0x110   : > { %v711_v39 = vld [vmem:[#allocation3 + $0xb] sm:$0xff]  ;;  %v708_v57 = vmul.f32 %v1393_v47, %v702_v31  ;;  %v726_v63 = vmul.f32 %v1384_v42, %v702_v31  ;;  %v866_v47 = vmul.f32 %v1434_v5, %v651_v28 }
 0x111   : > { %v762_v41 = vld [vmem:[#allocation3 + $0xc] sm:$0xff]  ;;  %v717_v25 = vmul.f32 %v1408_v54, %v711_v39  ;;  %v668_v50 = vadd.f32 %v666_v34, %v656_v58  ;;  %v1526_v6 = vld [vmem:[#allocation3 + $0x16] sm:$0xff] }
 0x112   : > { %v803_v43 = vld [vmem:[#allocation3 + $0x9] sm:$0xff]  ;;  %v768_v27 = vmul.f32 %v1411_v55, %v762_v41  ;;  %v1524_v40 = vld [vmem:[#allocation3 + $0x12] sm:$0xff]  ;;  %v1528_v7 = vld [vmem:[#allocation3 + $0x1a] sm:$0xff]  ;;  %v676_v30 = vmul.f32 %v1400_v49, %v1526_v6  ;;  %v693_v28 = vmul.f32 %v692_v9, %v1526_v6 }
 0x113   : > { %v813_v37 = vld [vmem:[#allocation3 + $0xd] sm:$0xff]  ;;  %v719_v1 = vadd.f32 %v717_v25, %v707_v0  ;;  %v809_v2 = vmul.f32 %v1417_v59, %v803_v43  ;;  %v677_v58 = vadd.f32 %v675_v53, %v668_v50  ;;  %v667_v42 = vmul.f32 %v1396_v48, %v1524_v40  ;;  %v1533_v0 = vld [vmem:[#allocation3 + $0x1e] sm:$0xff] }
 0x114   : > { %v819_v32 = vmul.f32 %v1420_v60, %v813_v37  ;;  %v770_v19 = vadd.f32 %v768_v27, %v758_v4  ;;  %v712_v20 = vld [vmem:[#allocation3 + $0x13] sm:$0xff]  ;;  %v730_v31 = vld [vmem:[#allocation3 + $0x1b] sm:$0xff]  ;;  %v684_v39 = vmul.f32 %v683_v8, %v1524_v40  ;;  %v685_v41 = vmul.f32 %v683_v8, %v1528_v7 }
 0x115   : > { %v728_v34 = vadd.f32 %v726_v63, %v719_v1  ;;  %v753_v43 = vld [vmem:[#allocation3 + $0x10] sm:$0xff]  ;;  %v669_v4 = vadd.f32 %v667_v42, %v657_v29  ;;  %v694_v27 = vmul.f32 %v692_v9, %v1533_v0  ;;  %v718_v48 = vmul.f32 %v1408_v54, %v712_v20  ;;  %v772_v37 = vld [vmem:[#allocation3 + $0x18] sm:$0xff] }
 0x116   : > { %v763_v25 = vld [vmem:[#allocation3 + $0x14] sm:$0xff]  ;;  %v686_v50 = vadd.f32 %v684_v39, %v677_v58  ;;  %v735_v53 = vmul.f32 %v1452_v12, %v712_v20  ;;  %v736_v63 = vmul.f32 %v1452_v12, %v730_v31  ;;  %v759_v49 = vmul.f32 %v1403_v51, %v753_v43  ;;  %v781_v42 = vld [vmem:[#allocation3 + $0x1c] sm:$0xff] }
 0x117   : > { %v678_v1 = vadd.f32 %v676_v30, %v669_v4  ;;  %v720_v10 = vadd.f32 %v718_v48, %v708_v57  ;;  %v769_v8 = vmul.f32 %v1411_v55, %v763_v25  ;;  %v777_v29 = vmul.f32 %v1455_v13, %v753_v43  ;;  %v804_v12 = vld [vmem:[#allocation3 + $0x11] sm:$0xff] }
 0x118   : > { %v695_v62 = vadd.f32 %v693_v28, %v686_v50  ;;  %v737_v22 = vadd.f32 %v735_v53, %v728_v34  ;;  %v778_v9 = vmul.f32 %v1455_v13, %v772_v37  ;;  %v786_v54 = vmul.f32 %v1458_v14, %v763_v25  ;;  %v814_v31 = vld [vmem:[#allocation3 + $0x15] sm:$0xff] }
 0x119   : > { %v687_v58 = vadd.f32 %v685_v41, %v678_v1  ;;  %v729_v39 = vadd.f32 %v727_v44, %v720_v10  ;;  %v771_v20 = vadd.f32 %v769_v8, %v759_v49  ;;  %v779_v17 = vadd.f32 %v777_v29, %v770_v19  ;;  %v823_v28 = vld [vmem:[#allocation3 + $0x19] sm:$0xff] }
 0x11a   : > { %v821_v51 = vadd.f32 %v819_v32, %v809_v2  ;;  %v697_v57 = vmul.f32 %v1449_v11, %v695_v62  ;;  %v746_v30 = vadd.f32 %v744_v45, %v737_v22  ;;  %v787_v55 = vmul.f32 %v1458_v14, %v781_v42  ;;  %v832_v45 = vld [vmem:[#allocation3 + $0x1d] sm:$0xff] }
 0x11b   : > { %v696_v43 = vadd.f32 %v694_v27, %v687_v58  ;;  %v738_v34 = vadd.f32 %v736_v63, %v729_v39  ;;  %v780_v4 = vadd.f32 %v778_v9, %v771_v20  ;;  %v788_v13 = vadd.f32 %v786_v54, %v779_v17  ;;  %v1640_v9 = vld [vmem:[#allocation5_spill] sm:$0xff] }
 0x11c   : > { %v748_v41 = vmul.f32 %v1466_v16, %v746_v30  ;;  %v810_v10 = vmul.f32 %v1417_v59, %v804_v12  ;;  %v820_v44 = vmul.f32 %v1420_v60, %v814_v31  ;;  %v828_v2 = vmul.f32 %v1483_v23, %v804_v12  ;;  %v1642_v12 = vld [vmem:[#allocation6_spill] sm:$0xff] }
 0x11d   : > { %v698_v62 = vmul.f32 %v1461_v15, %v696_v43  ;;  %v747_v11 = vadd.f32 %v1511_v46, %v738_v34  ;;  %v789_v14 = vadd.f32 %v787_v55, %v780_v4  ;;  %v795_v22 = vmul.f32 %v1473_v18, %v772_v37 }
 0x11e   : > { %v750_v17 = vadd.f32 %v748_v41, %v697_v57  ;;  %v822_v32 = vadd.f32 %v820_v44, %v810_v10  ;;  %v829_v16 = vmul.f32 %v1483_v23, %v823_v28  ;;  %v830_v19 = vadd.f32 %v828_v2, %v821_v51 }
 0x11f   : > { %v868_v59 = vadd.f32 %v866_v47, %v1522_v3  ;;  %v749_v60 = vmul.f32 %v1476_v21, %v747_v11  ;;  %v797_v25 = vadd.f32 %v795_v22, %v788_v13  ;;  %v837_v27 = vmul.f32 %v1494_v36, %v814_v31  ;;  %v886_v21 = vld [vmem:[#allocation3 + $0x22] sm:$0xff]  ;;  %v1154_v47 = vld [vmem:[%s1628_s3 + $0x18] ss:$0 sm:$0xff] }
 0x120   : > { %v831_v48 = vadd.f32 %v829_v16, %v822_v32  ;;  %v838_v15 = vmul.f32 %v1494_v36, %v832_v45  ;;  %v846_v46 = vmul.f32 %v1487_v26, %v823_v28  ;;  %v859_v18 = vmul.f32 %v1422_v61, %v1524_v40 }
 0x121   : > { %v751_v37 = vadd.f32 %v749_v60, %v698_v62  ;;  %v839_v50 = vadd.f32 %v837_v27, %v830_v19  ;;  %v867_v23 = vmul.f32 %v1434_v5, %v1526_v6  ;;  %v874_v3 = vmul.f32 %v1498_v38, %v1524_v40 }
 0x122   : > { %v798_v36 = vadd.f32 %v1490_v35, %v789_v14  ;;  %v801_v53 = vadd.f32 %v797_v25, %v750_v17  ;;  %v840_v26 = vadd.f32 %v838_v15, %v831_v48  ;;  %v875_v61 = vmul.f32 %v1498_v38, %v1528_v7 }
 0x123   : > { %v848_v63 = vadd.f32 %v846_v46, %v839_v50  ;;  %v869_v49 = vadd.f32 %v867_v23, %v859_v18  ;;  %v876_v1 = vadd.f32 %v874_v3, %v868_v59  ;;  %v882_v5 = vmul.f32 %v1502_v24, %v1526_v6  ;;  %v963_v18 = vld [vmem:[%s1391_s13] sm:$0xf] }
 0x124   : > { %v802_v8 = vadd.f32 %v798_v36, %v751_v37  ;;  %v849_v40 = vadd.f32 %v1508_v33, %v840_v26  ;;  %v883_v29 = vmul.f32 %v1502_v24, %v1533_v0  ;;  %v892_v42 = vmul.f32 %v1154_v47, %v886_v21 }
 0x125   : > { %v850_v35 = vmul.f32 %v1640_v9, %v848_v63  ;;  %v877_v54 = vadd.f32 %v875_v61, %v869_v49  ;;  %v884_v58 = vadd.f32 %v882_v5, %v876_v1  ;;  %v891_v39 = vmul.f32 %v1154_v47, %v1528_v7  ;;  %v1155_v7 = vld [vmem:[%s1629_s4] ss:$0 sm:$0xff]  ;;  %v967_v47 = vld [vmem:[%s1391_s13 + $0x8] sm:$0x1] }
 0x126   : > { %v1641_v38 = vmov 0.0   ;;  %v851_v31 = vmul.f32 %v1642_v12, %v849_v40 }
 0x127   : > { %v1152_v20 = vsel %vm633_vm9, 1.0, %v1641_v38  ;;  %v852_v6 = vadd.f32 %v850_v35, %v801_v53  ;;  %v885_v51 = vadd.f32 %v883_v29, %v877_v54  ;;  %v893_v57 = vadd.f32 %v891_v39, %v884_v58 }
 0x128   : > { %v1153_v24 = vsel %vm634_vm10, 1.0, %v1641_v38  ;;  %v853_v33 = vadd.f32 %v851_v31, %v802_v8 }
 0x129   : > { %v894_v0 = vadd.f32 %v892_v42, %v885_v51  ;;  %v895_v30 = vmul.f32 %v1152_v20, %v893_v57 }
 0x12b   : > { %v896_v55 = vmul.f32 %v1153_v24, %v894_v0  ;;  %v897_v43 = vadd.f32 %v895_v30, %v852_v6 }
 0x12d   : > { %v898_v34 = vadd.f32 %v896_v55, %v853_v33  ;;  %v905_v4 = vmul.f32 %v1155_v7, %v897_v43 }
 0x12f   : > { %v906_v13 = vmul.f32 %v1155_v7, %v898_v34  ;;  %v913_v28 = vadd.f32 %v1156_v52, %v905_v4 }
 0x131   : > { %v914_v41 = vadd.f32 %v1156_v52, %v906_v13  ;;  %v915_v56 = vadd.f32 3.0, %v913_v28 }
 0x133   : > { %v916_v10 = vadd.f32 3.0, %v914_v41  ;;  %v917_v44 = vmax.f32 %v915_v56, 0.0 }
 0x135   : > { %v918_v2 = vmax.f32 %v916_v10, 0.0  ;;  %v919_v62 = vmin.f32 %v917_v44, 6.0 }
 0x137   : > { %v920_v11 = vmin.f32 %v918_v2, 6.0  ;;  %v921_v14 = vmul.f32 %v919_v62, %v913_v28 }
 0x139   : > { %v922_v22 = vmul.f32 %v920_v11, %v914_v41  ;;  %v923_v45 = vmul.f32 0.16666667, %v921_v14 }
 0x13b   : > { %v924_v17 = vmul.f32 0.16666667, %v922_v22  ;;  %v1161_v32 = vpack.c.bf16 %v923_v45, %v923_v45 }
 0x13d   : > { %v1162_v16 = vpack.c.bf16 %v924_v17, %v924_v17  ;;  %v941_v19 = vshrl.u32 %v1161_v32, 16  ;;  %v944_v60 = vshll.u32 %v1161_v32, 16 }
 0x13f   : > { %v943_v59 = vrot.slane %v941_v19, 7  ;;  %v949_v25 = vshrl.u32 %v1162_v16, 16  ;;  %v952_v46 = vshll.u32 %v1162_v16, 16 }
 0x141   : > { %v946_v48 = vor.u32 %v944_v60, %v943_v59  ;;  %v951_v15 = vrot.slane %v949_v25, 7  ;;  %v947_v37 = vrot.slane %v943_v59, 4 }
 0x143   : > { %v954_v50 = vor.u32 %v952_v46, %v951_v15  ;;  %v964_v23 = vsel %vm1598_vm14, %v946_v48, %v963_v18  ;;  %v956_v21 = vrot.slane %v951_v15, 4 }
 0x144   : > { %965 = vst [vmem:[%s1391_s13] sm:$0xf] %v964_v23 }
 0x145   : > { %v955_v3 = vsel %vm939_vm15, %v947_v37, %v954_v50  ;;  %v968_v53 = vsel %vm1426_vm2, %v956_v21, %v967_v47 }
 0x146   : > { %966 = vst [vmem:[%s1391_s13 + $0x4] sm:$0xf] %v955_v3  ;;  %969 = vst [vmem:[%s1391_s13 + $0x8] sm:$0x1] %v968_v53 }
 0x14d   : > { %v970_v26 = vld [vmem:[%s1391_s13 + $0x8] sm:$0xf] }
 0x14e   : > { %v971_v61 = vsel %vm1598_vm14, 0, %v970_v26 }
 0x14f   : > { %972 = vst [vmem:[%s1391_s13 + $0x8] sm:$0xf] %v971_v61 }
 0x150 PF: > { %s16_s23 = sadd.s32 1, %s1256_s23   ;;  %s1646_s21 = smov %s1252_s22 }
 0x151   : > { %p13_p5 = scmp.ge.s32.totalorder %s16_s23, 4   ;;  %s1647_s22 = smov %s1649_s24 }
 0x153   :  { %15 = sbr.rel (!%p13_p5) target bundleno = 2 (0x2), region = 97 }

</bundles_post_ra>
